<compile_context>
chip_gen: v6e
topology: v6e:2x2x1
jax: 0.10.0
libtpu: 0.0.40
codegen_flags: <defaults>
</compile_context>

<pallas_src>
import functools

import jax
import jax.numpy as jnp
from jax.experimental import pallas as pl
from jax.experimental.pallas import tpu as pltpu


KNP = 384          # K*K*Cout = 264 zero-padded to 3 * 128 lanes


def _convt_leaky_kernel(x_ref, wb_ref, o_ref):
    # x_ref : (N, Cin, H*W)     input pixels, native NCHW order (free reshape)
    # wb_ref: (Cin + 1, KNP)    folded weight; last row is the bias, cols padded
    # o_ref : (N*H*W, KNP)      lane-dense output, columns (ki, kj, co) + pad
    n_batch = x_ref.shape[0]
    m = o_ref.shape[0]
    # Stack the batch and move Cin to the contraction (last) axis:
    # (N, Cin, HW) -> (N*HW, Cin).  Small 2-D XLU transposes + sublane concat.
    x2d = jnp.concatenate([x_ref[i].T for i in range(n_batch)], axis=0)
    # Append a ones column so the bias row of wb participates in the matmul.
    x_aug = jnp.concatenate([x2d, jnp.ones((m, 1), dtype=x2d.dtype)], axis=1)
    # Single MXU matmul: (N*HW, Cin+1) @ (Cin+1, KNP) -> (N*HW, KNP), f32 acc.
    y = jnp.dot(x_aug, wb_ref[...], preferred_element_type=jnp.float32)
    # torch.where(x6 > 0, x6, x6 * 10000)
    o_ref[...] = jnp.where(y > 0, y, y * 10000.0)


def prepare_params(weight, bias, knp=KNP):
    """Fold ConvTranspose2d params once (outside the per-call hot path)."""
    cin, cout, k, _ = weight.shape
    kn = k * k * cout
    # (Cin, Cout, K, K) -> (Cin, K, K, Cout) -> (Cin, KN): columns (ki, kj, co)
    w_t = jnp.transpose(weight, (0, 2, 3, 1)).reshape(cin, kn)
    b_row = jnp.tile(bias, k * k).reshape(1, kn)
    wb = jnp.concatenate([w_t, b_row], axis=0)             # (Cin+1, KN)
    wb = jnp.pad(wb, ((0, 0), (0, knp - kn)))               # (Cin+1, KNP)
    return wb


@functools.partial(jax.jit, static_argnames=("cout",))
def conv_transpose_leaky(x_nchw, wb, *, cout):
    """x_nchw: (N, Cin, H, W); wb: (Cin+1, KNP) folded weight+bias buffer."""
    n, cin, h, w = x_nchw.shape
    k = 2                                   # kernel == stride == 2, pad == 0
    kn = k * k * cout
    knp = wb.shape[1]
    hw = h * w
    m = n * hw

    x3 = x_nchw.reshape(n, cin, hw)         # free reshape, no transpose/copy

    flops = 2 * m * (cin + 1) * knp + 3 * m * knp
    bytes_accessed = 4 * (x3.size + wb.size + m * knp)

    vmem = pltpu.MemorySpace.VMEM
    out = pl.pallas_call(
        _convt_leaky_kernel,
        out_shape=jax.ShapeDtypeStruct((m, knp), jnp.float32),
        in_specs=[
            pl.BlockSpec(memory_space=vmem),
            pl.BlockSpec(memory_space=vmem),
        ],
        out_specs=pl.BlockSpec(memory_space=vmem),
        cost_estimate=pl.CostEstimate(
            flops=flops, transcendentals=0, bytes_accessed=bytes_accessed),
    )(x3, wb)

    # Drop the lane padding, then reassemble the stride-2 NCHW output:
    # (N*HW, KN) -> (N, H, W, K, K, Cout) -> (N, Cout, H, K, W, K) -> NCHW.
    y = out[:, :kn].reshape(n, h, w, k, k, cout)
    y = jnp.transpose(y, (0, 5, 1, 3, 2, 4)).reshape(n, cout, h * k, w * k)
    return y


def reference(x_nchw, weight, bias):
    # Pure-JAX reference (same non-overlapping stride-2 decomposition).
    n, cin, h, w = x_nchw.shape
    _, cout, k, _ = weight.shape
    y = jnp.einsum("nchw,cokl->nohkwl", x_nchw, weight)
    y = y + bias[None, :, None, None, None, None]
    y = y.reshape(n, cout, h * k, w * k)
    return jnp.where(y > 0, y, y * 10000.0)


if __name__ == "__main__":
    key = jax.random.PRNGKey(0)
    k1, k2, k3 = jax.random.split(key, 3)

    # Shapes from the PyTorch spec: x5 = torch.randn(3, 19, 4, 4)
    N, Cin, H, W = 3, 19, 4, 4
    Cout, K = 66, 2

    x5 = jax.random.normal(k1, (N, Cin, H, W), dtype=jnp.float32)
    bound = 1.0 / (Cin * K * K) ** 0.5      # PyTorch-like uniform init bound
    weight = jax.random.uniform(k2, (Cin, Cout, K, K), jnp.float32, -bound, bound)
    bias = jax.random.uniform(k3, (Cout,), jnp.float32, -bound, bound)

    wb = prepare_params(weight, bias)       # folded once, outside the hot path

    out = conv_transpose_leaky(x5, wb, cout=Cout)
    out = jax.block_until_ready(out)
    assert out.shape == (N, Cout, H * K, W * K), out.shape

    ref = reference(x5, weight, bias)

    # The x10000 negative branch amplifies accumulation-order differences near
    # y == 0 by 1e4, so compare the exactly-recoverable pre-activation values
    # tightly and the post-activation output with an amplification-aware
    # absolute tolerance (avoids flaky near-zero sign flips).
    pre_out = jnp.where(out > 0, out, out / 10000.0)
    pre_ref = jnp.where(ref > 0, ref, ref / 10000.0)
    assert jnp.allclose(pre_out, pre_ref, atol=1e-4, rtol=1e-4), float(
        jnp.max(jnp.abs(pre_out - pre_ref)))
    assert bool(jnp.all(jnp.abs(out - ref) <= 1e-3 * jnp.abs(ref) + 0.1)), float(
        jnp.max(jnp.abs(out - ref)))

    print("KERNEL_OK")
</pallas_src>

<mosaic_0001>
module attributes {stable_mosaic.version = 11 : i64} {
  func.func @_convt_leaky_kernel(%arg0: memref<3x19x16xf32, #tpu.memory_space<vmem>>, %arg1: memref<20x384xf32, #tpu.memory_space<vmem>>, %arg2: memref<48x384xf32, #tpu.memory_space<vmem>>) attributes {dimension_semantics = [], scalar_prefetch = 0 : i64, scratch_operands = 0 : i64, tpu.core_type = #tpu.core_type<tc>} {
    %c0 = arith.constant 0 : index
    %c0_0 = arith.constant 0 : index
    %c0_1 = arith.constant 0 : index
    %0 = vector.load %arg0[%c0, %c0_0, %c0_1] : memref<3x19x16xf32, #tpu.memory_space<vmem>>, vector<1x19x16xf32>
    %1 = vector.shape_cast %0 : vector<1x19x16xf32> to vector<19x16xf32>
    %2 = tpu.transpose %1, [1, 0] : vector<19x16xf32> -> vector<16x19xf32>
    %c1 = arith.constant 1 : index
    %c0_2 = arith.constant 0 : index
    %c0_3 = arith.constant 0 : index
    %3 = vector.load %arg0[%c1, %c0_2, %c0_3] : memref<3x19x16xf32, #tpu.memory_space<vmem>>, vector<1x19x16xf32>
    %4 = vector.shape_cast %3 : vector<1x19x16xf32> to vector<19x16xf32>
    %5 = tpu.transpose %4, [1, 0] : vector<19x16xf32> -> vector<16x19xf32>
    %c2 = arith.constant 2 : index
    %c0_4 = arith.constant 0 : index
    %c0_5 = arith.constant 0 : index
    %6 = vector.load %arg0[%c2, %c0_4, %c0_5] : memref<3x19x16xf32, #tpu.memory_space<vmem>>, vector<1x19x16xf32>
    %7 = vector.shape_cast %6 : vector<1x19x16xf32> to vector<19x16xf32>
    %8 = tpu.transpose %7, [1, 0] : vector<19x16xf32> -> vector<16x19xf32>
    %9 = tpu.concatenate %2, %5, %8 in 0 : vector<16x19xf32>, vector<16x19xf32>, vector<16x19xf32> -> vector<48x19xf32>
    %cst = arith.constant 1.000000e+00 : f32
    %10 = vector.broadcast %cst : f32 to vector<48x1xf32>
    %11 = tpu.concatenate %9, %10 in 1 : vector<48x19xf32>, vector<48x1xf32> -> vector<48x20xf32>
    %c0_6 = arith.constant 0 : index
    %c0_7 = arith.constant 0 : index
    %12 = vector.load %arg1[%c0_6, %c0_7] : memref<20x384xf32, #tpu.memory_space<vmem>>, vector<20x384xf32>
    %cst_8 = arith.constant dense<0.000000e+00> : vector<48x384xf32>
    %13 = tpu.matmul %11, %12, %cst_8 {dimension_numbers = #tpu.dot_dimension_numbers<[1], [0], [0], [1], [0, 0, 1, 1], [], []>} : vector<48x20xf32>, vector<20x384xf32>, vector<48x384xf32> -> vector<48x384xf32>
    %cst_9 = arith.constant 0.000000e+00 : f32
    %14 = vector.broadcast %cst_9 : f32 to vector<48x384xf32>
    %15 = arith.cmpf ogt, %13, %14 : vector<48x384xf32>
    %cst_10 = arith.constant 1.000000e+04 : f32
    %16 = vector.broadcast %cst_10 : f32 to vector<48x384xf32>
    %17 = arith.mulf %13, %16 : vector<48x384xf32>
    %18 = arith.select %15, %13, %17 : vector<48x384xi1>, vector<48x384xf32>
    %c0_11 = arith.constant 0 : index
    %c0_12 = arith.constant 0 : index
    %19 = vector.load %arg2[%c0_11, %c0_12] : memref<48x384xf32, #tpu.memory_space<vmem>>, vector<48x384xf32>
    tpu.vector_store %arg2[%c0_11, %c0_12], %18 {strides = array<i32>} : memref<48x384xf32, #tpu.memory_space<vmem>>, vector<48x384xf32>,
    return
  }
}

</mosaic_0001>

<bundles_post_ra>
// kernel: conv_transpose_leaky.1
= control target key start
LH: loop header
LB: loop body
LE: loop exit
PB: predicated region body
PF: predicated region fallthrough
CT: control target
= control target key end

     0   :  { %v487_v2 = vmov 0.0   ;;  %vm153_vm0 = vcmask 1043456   ;;  %vm118_vm1 = vcmask 154624   ;;  %vm134_vm2 = vcmask 162816   ;;  %s641_s0 = inlined_call_operand.vmem [shape: f32[3,19,16], index: 0, kind: input, shape index: {}]   ;;  %s642_s1 = inlined_call_operand.vmem [shape: f32[20,384], index: 1, kind: input, shape index: {}]   ;;  %s643_s2 = inlined_call_operand.vmem [shape: f32[48,384], index: 2, kind: output, shape index: {}]  }
   0x1   :  { %v438_v0 = vld [vmem:[%s641_s0 + $0x30] sm:$0xff]  ;;  %v11_v1 = vld [vmem:[%s641_s0] sm:$0xff]  ;;  %227 = vmatprep.mubr.f32.mxu0 %v487_v2  ;;  %257 = vmatprep.mubr.f32.mxu1 %v487_v2  ;;  %v439_v3 = vld [vmem:[%s641_s0 + $0x38] sm:$0xff] }
   0x2   :  { %86 = vxpose.xlu1.b32.start [1/3] (short) (narrow) %v438_v0, 16  ;;  %14 = vxpose.xlu0.b32.start [1/3] (short) (narrow) %v11_v1, 16  ;;  %v12_v4 = vld [vmem:[%s641_s0 + $0x8] sm:$0xff]  ;;  %v132_v5 = vld [vmem:[%s642_s1 + $0x38] sm:$0xf]  ;;  %v129_v7 = vld [vmem:[%s642_s1 + $0x20] sm:$0xff] }
   0x3   :  { %v131_v6 = vld [vmem:[%s642_s1 + $0x30] sm:$0xf]  ;;  %441 = vmatprep.subr.msk.mxu0 %vm153_vm0, %v132_v5  ;;  %480 = vmatprep.subr.msk.mxu1 %vm153_vm0, %v132_v5  ;;  %v128_v8 = vld [vmem:[%s642_s1 + $0x18] sm:$0xff]  ;;  %v440_v9 = vld [vmem:[%s641_s0 + $0x40] sm:$0x7] }
   0x4   :  { %v13_v10 = vld [vmem:[%s641_s0 + $0x10] sm:$0x7]  ;;  %442 = vmatpush1.msk.msra.mxu0 %vm153_vm0, %v131_v6  ;;  %483 = vmatpush1.msk.msra.mxu1 %vm153_vm0, %v131_v6  ;;  %v126_v11 = vld [vmem:[%s642_s1 + $0x8] sm:$0xff]  ;;  %v125_v12 = vld [vmem:[%s642_s1] sm:$0xff] }
   0x5   :  { %191 = vmatprep.subr.mxu0 %v129_v7  ;;  %481 = vmatprep.subr.mxu1 %v129_v7  ;;  %v133_v13 = vld [vmem:[%s642_s1 + $0x40] sm:$0xf]  ;;  %v435_v14 = vld [vmem:[%s641_s0 + $0x18] sm:$0xff]  ;;  %v437_v16 = vld [vmem:[%s641_s0 + $0x28] sm:$0x7] }
   0x6   :  { %87 = vxpose.xlu1.b32.cont [2/3] (short) (narrow) %v439_v3, 16  ;;  %15 = vxpose.xlu0.b32.cont [2/3] (short) (narrow) %v12_v4, 16  ;;  %v436_v15 = vld [vmem:[%s641_s0 + $0x20] sm:$0xff]  ;;  %v130_v24 = vld [vmem:[%s642_s1 + $0x28] sm:$0xff]  ;;  %v127_v25 = vld [vmem:[%s642_s1 + $0x10] sm:$0xff] }
   0x7   :  { %192 = vmatpush1.msra.mxu0 %v128_v8  ;;  %484 = vmatpush1.msra.mxu1 %v128_v8 }
   0x8   :  { %193 = vmatprep.subr.mxu0 %v126_v11  ;;  %482 = vmatprep.subr.mxu1 %v126_v11 }
   0x9   :  { %194 = vmatpush1.msra.mxu0 %v125_v12  ;;  %485 = vmatpush1.msra.mxu1 %v125_v12 }
   0xa   :  { %88 = vxpose.xlu1.b32.end [3/3] (short) (narrow) %v440_v9, 16  ;;  %16 = vxpose.xlu0.b32.end [3/3] (short) (narrow) %v13_v10, 16 }
   0xb   :  { %465 = vmatprep.subr.msk.mxu1 %vm153_vm0, %v133_v13 }
   0xe   :  { %50 = vxpose.xlu0.b32.start [1/3] (short) (narrow) %v435_v14, 16 }
  0x12   :  { %51 = vxpose.xlu0.b32.cont [2/3] (short) (narrow) %v436_v15, 16 }
  0x16   :  { %52 = vxpose.xlu0.b32.end [3/3] (short) (narrow) %v437_v16, 16 }
  0x7e   :  { %v102_v17 = vpop.trf.xlu1  ;;  %v30_v18 = vpop.trf.xlu0 }
  0x7f   :  { %v119_v19 = vsel %vm118_vm1, %v30_v18, 1.0  ;;  %v123_v30 = vsel %vm118_vm1, %v102_v17, 1.0 }
  0x80   :  { %443 = vmatmul.mubr.msk.f32.vlgmr.msra.gmra.mxu0 %vm134_vm2, %v119_v19 }
  0x81   :  { %233 = vmatprep.mubr.f32.mxu0 %v487_v2 }
  0x82   :  { %v103_v20 = vpop.trf.xlu1  ;;  %v31_v21 = vpop.trf.xlu0 }
  0x83   :  { %v124_v22 = vsel %vm118_vm1, %v103_v20, 1.0  ;;  %v120_v23 = vsel %vm118_vm1, %v31_v21, 1.0 }
  0x84   :  { %444 = vmatmul.mubr.msk.f32.gmra.mxu0 %vm134_vm2, %v120_v23  ;;  %448 = vmatmul.mubr.msk.f32.vlgmr.msra.gmra.mxu1 %vm134_vm2, %v124_v22 }
  0x85   :  { %466 = vmatpush3.msk.msra.mxu1 %vm153_vm0, %v133_v13  ;;  %471 = vmatprep.mubr.msk.f32.mxu1 %vm134_vm2, %v119_v19 }
  0x86   :  { %467 = vmatprep.subr.mxu1 %v130_v24  ;;  %239 = vmatprep.mubr.f32.mxu0 %v487_v2 }
  0x87   :  { %468 = vmatpush3.msra.mxu1 %v130_v24 }
  0x88   :  { %469 = vmatprep.subr.mxu1 %v127_v25 }
  0x89   :  { %470 = vmatpush3.msra.mxu1 %v127_v25 }
  0x8a   :  { %472 = vmatmul.mubr.msk.f32.vlgmr.msra.gmra.mxu1 %vm134_vm2, %v120_v23  ;;  %v66_v26 = vpop.trf.xlu0 }
  0x8b   :  { %v121_v27 = vsel %vm118_vm1, %v66_v26, 1.0 }
  0x8c   :  { %445 = vmatmul.mubr.msk.f32.gmra.mxu0 %vm134_vm2, %v121_v27  ;;  %474 = vmatprep.mubr.msk.f32.mxu1 %vm134_vm2, %v121_v27 }
  0x8d   :  { %245 = vmatprep.mubr.f32.mxu0 %v487_v2 }
  0x8e   :  { %v67_v28 = vpop.trf.xlu0 }
  0x8f   :  { %v122_v29 = vsel %vm118_vm1, %v67_v28, 1.0 }
  0x90   :  { %446 = vmatmul.mubr.msk.f32.gmra.mxu0 %vm134_vm2, %v122_v29  ;;  %475 = vmatmul.mubr.msk.f32.gmra.mxu1 %vm134_vm2, %v122_v29 }
  0x91   :  { %477 = vmatprep.mubr.msk.f32.mxu1 %vm134_vm2, %v123_v30  ;;  %251 = vmatprep.mubr.f32.mxu0 %v487_v2 }
  0x94   :  { %447 = vmatmul.mubr.msk.f32.gmra.mxu0 %vm134_vm2, %v123_v30  ;;  %478 = vmatmul.mubr.msk.f32.gmra.mxu1 %vm134_vm2, %v124_v22 }
 0x140   :  { %v229_v31 = vpop.f32.mrf.mxu0 }
 0x141   :  { %vm359_vm3 = vcmp.gt.f32.partialorder %v229_v31, 0.0  ;;  %v377_v32 = vmul.f32 10000.0, %v229_v31 }
 0x142   :  { %v231_v33 = vpop.f32.mrf.mxu0 }
 0x143   :  { %v395_v34 = vsel %vm359_vm3, %v229_v31, %v377_v32  ;;  %vm360_vm4 = vcmp.gt.f32.partialorder %v231_v33, 0.0  ;;  %v378_v35 = vmul.f32 10000.0, %v231_v33 }
 0x144   :  { %413 = vst [vmem:[%s643_s2] sm:$0xff] %v395_v34  ;;  %v235_v36 = vpop.f32.mrf.mxu0  ;;  %v259_v37 = vpop.f32.mrf.mxu1 }
 0x145   :  { %v396_v38 = vsel %vm360_vm4, %v231_v33, %v378_v35  ;;  %vm362_vm5 = vcmp.gt.f32.partialorder %v235_v36, 0.0  ;;  %v380_v39 = vmul.f32 10000.0, %v235_v36  ;;  %vm374_vm6 = vcmp.gt.f32.partialorder %v259_v37, 0.0 }
 0x146   :  { %414 = vst [vmem:[%s643_s2 + $0x8] sm:$0xff] %v396_v38  ;;  %v392_v40 = vmul.f32 10000.0, %v259_v37  ;;  %v237_v41 = vpop.f32.mrf.mxu0  ;;  %v261_v42 = vpop.f32.mrf.mxu1 }
 0x147   :  { %v398_v43 = vsel %vm362_vm5, %v235_v36, %v380_v39  ;;  %vm363_vm7 = vcmp.gt.f32.partialorder %v237_v41, 0.0  ;;  %v381_v44 = vmul.f32 10000.0, %v237_v41  ;;  %vm375_vm8 = vcmp.gt.f32.partialorder %v261_v42, 0.0 }
 0x148   :  { %416 = vst [vmem:[%s643_s2 + $0x18] sm:$0xff] %v398_v43  ;;  %v410_v45 = vsel %vm374_vm6, %v259_v37, %v392_v40  ;;  %v393_v46 = vmul.f32 10000.0, %v261_v42 }
 0x149   :  { %428 = vst [vmem:[%s643_s2 + $0x78] sm:$0xff] %v410_v45  ;;  %v399_v47 = vsel %vm363_vm7, %v237_v41, %v381_v44 }
 0x14a   :  { %417 = vst [vmem:[%s643_s2 + $0x20] sm:$0xff] %v399_v47  ;;  %v411_v48 = vsel %vm375_vm8, %v261_v42, %v393_v46  ;;  %v473_v49 = vpop.f32.mrf.mxu1 }
 0x14b   :  { %429 = vst [vmem:[%s643_s2 + $0x80] sm:$0xff] %v411_v48  ;;  %vm364_vm9 = vcmp.gt.f32.partialorder %v473_v49, 0.0  ;;  %v382_v50 = vmul.f32 10000.0, %v473_v49 }
 0x14c   :  { %v330_v51 = vpop.f32.mrf.mxu1  ;;  %v241_v52 = vpop.f32.mrf.mxu0 }
 0x14d   :  { %v400_v53 = vsel %vm364_vm9, %v473_v49, %v382_v50  ;;  %vm361_vm10 = vcmp.gt.f32.partialorder %v330_v51, 0.0  ;;  %v379_v54 = vmul.f32 10000.0, %v330_v51  ;;  %vm365_vm11 = vcmp.gt.f32.partialorder %v241_v52, 0.0 }
 0x14e   :  { %418 = vst [vmem:[%s643_s2 + $0x28] sm:$0xff] %v400_v53  ;;  %v383_v55 = vmul.f32 10000.0, %v241_v52  ;;  %v243_v56 = vpop.f32.mrf.mxu0 }
 0x14f   :  { %v397_v57 = vsel %vm361_vm10, %v330_v51, %v379_v54  ;;  %vm366_vm12 = vcmp.gt.f32.partialorder %v243_v56, 0.0  ;;  %v384_v58 = vmul.f32 10000.0, %v243_v56 }
 0x150   :  { %415 = vst [vmem:[%s643_s2 + $0x10] sm:$0xff] %v397_v57  ;;  %v401_v59 = vsel %vm365_vm11, %v241_v52, %v383_v55  ;;  %v247_v60 = vpop.f32.mrf.mxu0  ;;  %v476_v61 = vpop.f32.mrf.mxu1 }
 0x151   :  { %419 = vst [vmem:[%s643_s2 + $0x30] sm:$0xff] %v401_v59  ;;  %v402_v62 = vsel %vm366_vm12, %v243_v56, %v384_v58  ;;  %vm368_vm13 = vcmp.gt.f32.partialorder %v247_v60, 0.0  ;;  %v386_v63 = vmul.f32 10000.0, %v247_v60  ;;  %vm370_vm14 = vcmp.gt.f32.partialorder %v476_v61, 0.0 }
 0x152   :  { %420 = vst [vmem:[%s643_s2 + $0x38] sm:$0xff] %v402_v62  ;;  %v388_v0 = vmul.f32 10000.0, %v476_v61  ;;  %v249_v1 = vpop.f32.mrf.mxu0  ;;  %v340_v2 = vpop.f32.mrf.mxu1 }
 0x153   :  { %v404_v3 = vsel %vm368_vm13, %v247_v60, %v386_v63  ;;  %vm369_vm15 = vcmp.gt.f32.partialorder %v249_v1, 0.0  ;;  %v387_v4 = vmul.f32 10000.0, %v249_v1  ;;  %vm367_vm0 = vcmp.gt.f32.partialorder %v340_v2, 0.0 }
 0x154   :  { %422 = vst [vmem:[%s643_s2 + $0x48] sm:$0xff] %v404_v3  ;;  %v406_v5 = vsel %vm370_vm14, %v476_v61, %v388_v0  ;;  %v385_v6 = vmul.f32 10000.0, %v340_v2  ;;  %v253_v7 = vpop.f32.mrf.mxu0  ;;  %v479_v8 = vpop.f32.mrf.mxu1 }
 0x155   :  { %424 = vst [vmem:[%s643_s2 + $0x58] sm:$0xff] %v406_v5  ;;  %v405_v9 = vsel %vm369_vm15, %v249_v1, %v387_v4  ;;  %vm371_vm1 = vcmp.gt.f32.partialorder %v253_v7, 0.0  ;;  %v389_v10 = vmul.f32 10000.0, %v253_v7  ;;  %vm376_vm2 = vcmp.gt.f32.partialorder %v479_v8, 0.0 }
 0x156   :  { %423 = vst [vmem:[%s643_s2 + $0x50] sm:$0xff] %v405_v9  ;;  %v403_v11 = vsel %vm367_vm0, %v340_v2, %v385_v6  ;;  %v394_v12 = vmul.f32 10000.0, %v479_v8  ;;  %v255_v13 = vpop.f32.mrf.mxu0  ;;  %v350_v14 = vpop.f32.mrf.mxu1 }
 0x157   :  { %421 = vst [vmem:[%s643_s2 + $0x40] sm:$0xff] %v403_v11  ;;  %v407_v15 = vsel %vm371_vm1, %v253_v7, %v389_v10  ;;  %vm372_vm3 = vcmp.gt.f32.partialorder %v255_v13, 0.0  ;;  %v390_v16 = vmul.f32 10000.0, %v255_v13  ;;  %vm373_vm4 = vcmp.gt.f32.partialorder %v350_v14, 0.0 }
 0x158   :  { %425 = vst [vmem:[%s643_s2 + $0x60] sm:$0xff] %v407_v15  ;;  %v412_v17 = vsel %vm376_vm2, %v479_v8, %v394_v12  ;;  %v391_v18 = vmul.f32 10000.0, %v350_v14 }
 0x159   :  { %430 = vst [vmem:[%s643_s2 + $0x88] sm:$0xff] %v412_v17  ;;  %v408_v19 = vsel %vm372_vm3, %v255_v13, %v390_v16 }
 0x15a   :  { %426 = vst [vmem:[%s643_s2 + $0x68] sm:$0xff] %v408_v19  ;;  %v409_v20 = vsel %vm373_vm4, %v350_v14, %v391_v18 }
 0x15b   :  { %427 = vst [vmem:[%s643_s2 + $0x70] sm:$0xff] %v409_v20 }

</bundles_post_ra>
